<compile_context>
chip_gen: v5e
topology: v5e:2x2
jax: 0.10.0
libtpu: 0.0.40
codegen_flags: <defaults>
</compile_context>

<pallas_src>
import math
import functools

import jax
import jax.numpy as jnp
from jax.experimental import pallas as pl
from jax.experimental.pallas import tpu as pltpu


# Keep the total double-buffered window footprint well under the 32 MiB scoped
# VMEM limit (and v7x's 64 MiB physical VMEM per TensorCore).
_VMEM_BUDGET_BYTES = 24 * 1024 * 1024
_VMEM_LIMIT_BYTES = 32 * 1024 * 1024


# ----------------------------------------------------------------------------
# Kernels
# ----------------------------------------------------------------------------
def _pe_add_kernel(x_ref, pe_ref, o_ref):
    """Pure streaming add: o = x + pe (pe precomputed, batch-tiled)."""
    o_ref[...] = (x_ref[...].astype(jnp.float32) + pe_ref[...]).astype(o_ref.dtype)


def _pe_sin_kernel(x_ref, sp_ref, o_ref, *, tile_s):
    """Fused variant: pe computed in-kernel as sin(pos*scale + phase)."""
    # Absolute sequence position of every row in this tile: (tile_s, 1) f32.
    s0 = (pl.program_id(0) * tile_s).astype(jnp.float32)
    pos = jax.lax.broadcasted_iota(jnp.float32, (tile_s, 1), 0) + s0

    sp = sp_ref[...]                       # (2, C) f32: row0=inv_freq, row1=phase
    angle = pos * sp[0:1, :] + sp[1:2, :]  # (tile_s, C); cos folded via +pi/2 phase
    pe = jnp.sin(angle)

    o_ref[...] = (x_ref[...].astype(jnp.float32) + pe).astype(o_ref.dtype)


# ----------------------------------------------------------------------------
# Wrapper helpers
# ----------------------------------------------------------------------------
def make_pe_table(seq_len, d_model):
    """Sinusoidal pe table (seq_len, d_model) f32 — PyTorch register_buffer analogue.

    In a real model build this once (e.g. for max_len) and reuse it.
    """
    assert d_model % 2 == 0, "d_model must be even (matches PyTorch module)"
    pos = jnp.arange(seq_len, dtype=jnp.float32)[:, None]
    div = jnp.exp(jnp.arange(0, d_model, 2, dtype=jnp.float32)
                  * (-math.log(10000.0) / d_model))
    pe = jnp.zeros((seq_len, d_model), jnp.float32)
    pe = pe.at[:, 0::2].set(jnp.sin(pos * div))
    pe = pe.at[:, 1::2].set(jnp.cos(pos * div))
    return pe


def _default_mode():
    """Pick the kernel variant per chip generation."""
    try:
        kind = jax.devices()[0].device_kind.lower()
    except Exception:
        kind = ""
    # <= v6: HBM is slow enough that the in-kernel sin hides under DMA and we
    # save the pe read traffic.  v7x-class / unknown: sin (VPU polynomial, not
    # EUP) would become the binding slot at 3.2 TB/s, so use the precomputed
    # table and a pure streaming add.
    if any(tag in kind for tag in ("v2", "v3", "v4", "v5", "v6")):
        return "sin"
    return "add"


def _auto_tile_s(S, bytes_per_row_all_windows, sub):
    """Rows per block s.t. double-buffered in+out windows fit the VMEM budget."""
    t = _VMEM_BUDGET_BYTES // max(1, 2 * bytes_per_row_all_windows)
    t = max(sub, (t // sub) * sub)
    # Prefer >= 4 grid steps when S allows, so the "parallel" sequence axis can
    # actually shard across multiple TensorCores (v7x megacore).
    if S >= 4 * sub:
        cap = -(-S // 4)                 # ceil(S / 4)
        cap = -(-cap // sub) * sub       # round up to sublane multiple
        t = min(t, max(sub, cap))
    return S if t >= S else t


def _common_specs(tile_s, C):
    x_spec = pl.BlockSpec((tile_s, C), lambda i: (i, 0))
    return x_spec


# ----------------------------------------------------------------------------
# Public entry point
# ----------------------------------------------------------------------------
def positional_encoding(x, *, mode=None, tile_s=None, pe_table=None, donate=False):
    """x: [S, B, D] float array. Returns x + sinusoidal positional encoding."""
    S, B, D = x.shape
    assert D % 2 == 0, "d_model must be even (matches PyTorch module)"
    C = B * D

    if mode is None:
        mode = _default_mode()

    # Lane-dense 2D view: row = sequence position, columns = batch-major
    # concatenation of the D features (contiguous reshape, no data movement).
    # TODO(synk): C=500 pads to 512 lanes (~2-3% masked-store waste); padding
    # d_model 250->256 at the model level would remove it.
    x2d = x.reshape(S, C)

    itemsize = jnp.dtype(x.dtype).itemsize
    sub = 8 * max(1, 4 // itemsize)      # sublane-aligned rows: 8 f32, 16 bf16

    if mode == "add":
        # Precompute the pe table (register_buffer style) and tile across batch
        # so the kernel is a pure two-operand streaming add.
        if pe_table is None:
            pe_table = make_pe_table(S, D)
        pe_c = jnp.tile(pe_table[:S].astype(jnp.float32), (1, B))       # (S, C)
        # Windows per row: x-in + pe-in (f32) + out.
        row_bytes = C * (itemsize + 4 + itemsize)
        if tile_s is None:
            tile_s = _auto_tile_s(S, row_bytes, sub)
        assert tile_s == S or tile_s % sub == 0, "tile_s must be sublane-aligned"

        kernel = _pe_add_kernel
        extra_operand = pe_c
        extra_spec = pl.BlockSpec((tile_s, C), lambda i: (i, 0))
    else:
        # Fused sin variant: one merged (2, C) row operand: [inv_freq; phase].
        j = jnp.arange(D, dtype=jnp.int32)
        parity = (j % 2).astype(jnp.float32)                 # 0 even, 1 odd
        j_even = j.astype(jnp.float32) - parity               # 2 * (j // 2)
        inv_freq = jnp.exp(-j_even * (math.log(10000.0) / D))  # (D,)
        phase = parity * (math.pi / 2.0)                       # cos = sin(.+pi/2)
        sp = jnp.stack([jnp.tile(inv_freq, B), jnp.tile(phase, B)], axis=0)  # (2, C)
        # Windows per row: x-in + out (the (2, C) row is negligible).
        row_bytes = C * (2 * itemsize)
        if tile_s is None:
            tile_s = _auto_tile_s(S, row_bytes, sub)
        assert tile_s == S or tile_s % sub == 0, "tile_s must be sublane-aligned"

        kernel = functools.partial(_pe_sin_kernel, tile_s=tile_s)
        extra_operand = sp
        extra_spec = pl.BlockSpec((2, C), lambda i: (0, 0))

    x_spec = pl.BlockSpec((tile_s, C), lambda i: (i, 0))

    out2d = pl.pallas_call(
        kernel,
        out_shape=jax.ShapeDtypeStruct((S, C), x.dtype),
        grid_spec=pltpu.PrefetchScalarGridSpec(
            num_scalar_prefetch=0,
            grid=(pl.cdiv(S, tile_s),),
            in_specs=[x_spec, extra_spec],
            out_specs=pl.BlockSpec((tile_s, C), lambda i: (i, 0)),
        ),
        compiler_params=pltpu.CompilerParams(
            dimension_semantics=("parallel",),
            vmem_limit_bytes=_VMEM_LIMIT_BYTES,
        ),
        # Only alias when the caller actually donates x; otherwise XLA inserts
        # a defensive copy and the aliasing buys nothing.
        input_output_aliases=({0: 0} if donate else {}),
    )(x2d, extra_operand)

    return out2d.reshape(S, B, D)


# ----------------------------------------------------------------------------
# Pure-JAX reference (matches the PyTorch module in eval mode)
# ----------------------------------------------------------------------------
def positional_encoding_ref(x):
    S, _, D = x.shape
    pe = make_pe_table(S, D)                                   # (S, D) f32
    return (x.astype(jnp.float32) + pe[:, None, :]).astype(x.dtype)


if __name__ == "__main__":
    key = jax.random.PRNGKey(0)
    # d_model=250 matches TransAm's feature_size; small seq/batch for the demo.
    S, B, D = 64, 2, 250
    x = jax.random.normal(key, (S, B, D), dtype=jnp.float32)

    ref = positional_encoding_ref(x)

    # Auto (chip-dispatched) path.
    out = jax.block_until_ready(positional_encoding(x))
    assert out.shape == (S, B, D)
    assert jnp.allclose(out, ref, atol=1e-4, rtol=1e-4), "mismatch vs reference"

    # Exercise both kernel variants, auto-tiled (multi-step grid) and single-block.
    for mode in ("add", "sin"):
        for ts in (None, S):
            o = jax.block_until_ready(positional_encoding(x, mode=mode, tile_s=ts))
            assert jnp.allclose(o, ref, atol=1e-4, rtol=1e-4), (
                f"mismatch vs reference: mode={mode}, tile_s={ts}")

    print("KERNEL_OK")
</pallas_src>

<mosaic_0001>
module attributes {stable_mosaic.version = 11 : i64} {
  func.func @_pe_add_kernel(%arg0: i32, %arg1: memref<16x500xf32, #tpu.memory_space<vmem>>, %arg2: memref<16x500xf32, #tpu.memory_space<vmem>>, %arg3: memref<16x500xf32, #tpu.memory_space<vmem>>) attributes {dimension_semantics = [#tpu.dimension_semantics<parallel>], iteration_bounds = array<i64: 4>, scalar_prefetch = 0 : i64, scratch_operands = 0 : i64, tpu.core_type = #tpu.core_type<tc>, window_params = [{transform_indices = @transform_0, window_bounds = array<i64: 16, 500>}, {transform_indices = @transform_1, window_bounds = array<i64: 16, 500>}, {transform_indices = @transform_2, window_bounds = array<i64: 16, 500>}]} {
    %c0 = arith.constant 0 : index
    %c0_0 = arith.constant 0 : index
    %0 = vector.load %arg1[%c0, %c0_0] : memref<16x500xf32, #tpu.memory_space<vmem>>, vector<16x500xf32>
    %c0_1 = arith.constant 0 : index
    %c0_2 = arith.constant 0 : index
    %1 = vector.load %arg2[%c0_1, %c0_2] : memref<16x500xf32, #tpu.memory_space<vmem>>, vector<16x500xf32>
    %2 = arith.addf %0, %1 : vector<16x500xf32>
    %c0_3 = arith.constant 0 : index
    %c0_4 = arith.constant 0 : index
    %3 = vector.load %arg3[%c0_3, %c0_4] : memref<16x500xf32, #tpu.memory_space<vmem>>, vector<16x500xf32>
    tpu.vector_store %arg3[%c0_3, %c0_4], %2 {strides = array<i32>} : memref<16x500xf32, #tpu.memory_space<vmem>>, vector<16x500xf32>,
    return
  }
  func.func @transform_0(%arg0: i32) -> (i32, i32) {
    %c0_i32 = arith.constant 0 : i32
    %c0_i32_0 = arith.constant 0 : i32
    return %arg0, %c0_i32 : i32, i32
  }
  func.func @transform_1(%arg0: i32) -> (i32, i32) {
    %c0_i32 = arith.constant 0 : i32
    %c0_i32_0 = arith.constant 0 : i32
    return %arg0, %c0_i32 : i32, i32
  }
  func.func @transform_2(%arg0: i32) -> (i32, i32) {
    %c0_i32 = arith.constant 0 : i32
    %c0_i32_0 = arith.constant 0 : i32
    return %arg0, %c0_i32 : i32, i32
  }
}

</mosaic_0001>

<bundles_post_ra>
// kernel: tpu_custom_call.1
= control target key start
LH: loop header
LB: loop body
LE: loop exit
PB: predicated region body
PF: predicated region fallthrough
CT: control target
= control target key end

     0   :  { %7 = vsyncpa [#allocation3], 0  ;;  %s778_s0 = inlined_call_operand.hbm [shape: f32[64,500], index: 0, kind: input, shape index: {}]   ;;  %s779_s1 = inlined_call_operand.hbm [shape: f32[64,500], index: 1, kind: input, shape index: {}]   ;;  %s780_s2 = inlined_call_operand.hbm [shape: f32[64,500], index: 2, kind: output, shape index: {}]  }
   0x1   :  { %9 = vsyncpa [#allocation3 + $0x1], 0 }
   0x2   :  { %10 = vsyncpa [#allocation6], 0 }
   0x3   :  { %12 = vsyncpa [#allocation6 + $0x1], 0 }
   0x4   :  { %13 = vsyncpa [#allocation4], 0 }
   0x5   :  { %15 = vsyncpa [#allocation4 + $0x1], 0  ;;  %s590_s9 = smov 0   ;;  %s592_s10 = smov 0  }
   0x6   :  { %s594_s11 = smov 0   ;;  %s596_s12 = smov 0  }
   0x7 LB: > { %s611_s13 = sadd.s32 4294967295, %s569_s12   ;;  %s357_s14 = sadd.s32 4294967294, %s569_s12   ;;  %s569_s12 = sphi %s596_s12, %s790_s12   ;;  %s565_s11 = sphi %s594_s11, %s789_s11   ;;  %s561_s10 = sphi %s592_s10, %s788_s10   ;;  %s557_s9 = sphi %s590_s9, %s787_s9  }
   0x8   : > { %s615_s15 = sadd.s32 1, %s569_s12   ;;  %s28_s16 = sadd.s32 1, %s565_s11 }
   0x9   : > { %s25_s17 = ssub.s32 %s569_s12, %s615_s15  ;;  %p35_p0 = scmp.ne.s32.totalorder %s565_s11, %s561_s10 }
   0xa   : > { %p26_p1 = scmp.eq.s32.totalorder %s25_s17, 0  ;;  %p36_p2 = scmp.eq.s32.totalorder %s569_s12, 0 }
   0xb   : > { %p41_p3 = scmp.ne.s32.totalorder %s561_s10, %s557_s9  ;;  %p42_p4 = scmp.eq.s32.totalorder %s611_s13, 0 }
   0xc   : > { %s627_s18 = scalar_select %p26_p1, %s565_s11, %s28_s16  }
   0xd   : > { %p629_p5 = por %p36_p2, %p35_p0  ;;  %p633_p6 = por %p42_p4, %p41_p3 }
   0xe   : > { %p91_p7 = scmp.eq.s32.totalorder %s611_s13, 3  ;;  %p97_p8 = scmp.eq.s32.totalorder %s357_s14, 3 }
   0xf   : > { %p401_p9 = scmp.lt.s32.totalorder %s569_s12, 4  ;;  %s648_s23 = sand.u32 1, %s565_s11  }
  0x10   : > { %p639_p10 = por %p91_p7, %p35_p0  ;;  %p643_p11 = por %p97_p8, %p41_p3 }
  0x11   : > { %s379_s24 = sshll.u32 %s569_s12, 6  ;;  %s360_s25 = sshll.u32 %s648_s23, 6 }
  0x12   : > { %s127_s28 = scalar_lea.hbm %s778_s0, %s379_s24  ;;  %s121_s30 = scalar_lea.vmem [#allocation2], %s360_s25 }
  0x13   : > { %s128_s29 = sshll.u32 %s127_s28, 4  ;;  %s130_s3 = sshll.u32 %s121_s30, 4  ;;  %s129_s29 = int_to_ptr.hbm [resolvable:$true] %s128_s29  ;;  %s131_s3 = int_to_ptr.vmem [resolvable:$true] %s130_s3 }
  0x14   : > { %p661_p12 = pnand %p401_p9, %p629_p5  ;;  %p368_p13 = scmp.ge.s32.totalorder %s569_s12, 1 }
  0x15   : > { %p161_p0 = scmp.lt.s32.totalorder %s569_s12, 5  ;;  %s118_s5 = scalar_lea.sflag [#allocation3], %s648_s23 }
  0x16   : > { %s439_s6 = sshra.s32 %s129_s29, 4  ;;  %p443_p2 = pneg %p661_p12  ;;  %s440_s6 = int_to_ptr.hbm [resolvable:$true] %s439_s6 }
  0x17   : > { %s441_s7 = scalar_lea.hbm %s440_s6, 64  ;;  %s446_s16 = scalar_lea.hbm %s778_s0, 256 }
  0x18   : > { %p442_p1 = scmp.ne.s32.totalorder %s440_s6, %s441_s7  ;;  %p447_p5 = scmp.lt.s32.totalorder %s440_s6, %s778_s0 }
  0x19   : > { %p448_p7 = scmp.lt.s32.totalorder %s446_s16, %s441_s7 }
  0x1a   : > { %p444_p3 = pnand %p443_p2, %p442_p1 }
  0x1b   : > { %p449_p8 = por %p448_p7, %p447_p5 }
  0x1c   : > { %p445_p4 = pneg %p444_p3 }
  0x1e   : > { %p450_p9 = pnand %p449_p8, %p445_p4 }
  0x20   : > { %453 = shalt.err (!%p450_p9)
}
  0x21   : > { %s571_s26 = smov 512   ;;  %s572_s27 = smov 32  }
  0x22   : > { %393 = dma.hbm_to_vmem [thread:$0]  (!%p661_p12), %s129_s29, 1024, %s131_s3, %s118_s5, %s571_s26, %s571_s26, %s572_s27  }
  0x23   : > { %p685_p1 = pnand %p368_p13, %p161_p0  ;;  %s150_s7 = scalar_lea.hbm %s779_s1, %s379_s24 }
  0x24   : > { %s151_s8 = sshll.u32 %s150_s7, 4  ;;  %s144_s14 = scalar_lea.vmem [#allocation5], %s360_s25  ;;  %s152_s8 = int_to_ptr.hbm [resolvable:$true] %s151_s8 }
  0x25   : > { %s153_s16 = sshll.u32 %s144_s14, 4  ;;  %s141_s17 = scalar_lea.sflag [#allocation6], %s648_s23  ;;  %s154_s16 = int_to_ptr.vmem [resolvable:$true] %s153_s16 }
  0x26   : > { %s469_s19 = sshra.s32 %s152_s8, 4  ;;  %s476_s30 = scalar_lea.hbm %s779_s1, 256  ;;  %s470_s19 = int_to_ptr.hbm [resolvable:$true] %s469_s19 }
  0x27   : > { %s471_s29 = scalar_lea.hbm %s470_s19, 64  ;;  %p477_p4 = scmp.lt.s32.totalorder %s470_s19, %s779_s1 }
  0x28   : > { %p472_p3 = scmp.ne.s32.totalorder %s470_s19, %s471_s29  ;;  %p478_p5 = scmp.lt.s32.totalorder %s476_s30, %s471_s29 }
  0x2a   : > { %p474_p13 = pnand %p472_p3, %p443_p2  ;;  %p479_p7 = por %p478_p5, %p477_p4 }
  0x2c   : > { %p475_p0 = pneg %p474_p13 }
  0x2e   : > { %p480_p8 = pnand %p479_p7, %p475_p0 }
  0x30   : > { %483 = shalt.err (!%p480_p8)
}
  0x31   : > { %396 = dma.hbm_to_vmem [thread:$0]  (!%p661_p12), %s152_s8, 1024, %s154_s16, %s141_s17, %s571_s26, %s571_s26, %s572_s27  }
  0x32   : > { %165 = sbr.rel (%p685_p1) target bundleno = 74 (0x4a), region = 28  ;;  %s711_s23 = sand.u32 (!%p685_p1), 1, %s561_s10  }
  0x33   : > { %s369_s25 = sshll.u32 (!%p685_p1), %s711_s23, 6  ;;  %s168_s7 = scalar_lea.sflag (!%p685_p1), [#allocation3], %s711_s23 }
  0x34   : > { %s715_s14 = scalar_lea.vmem (!%p685_p1), [#allocation2], %s369_s25 }
  0x37   : > { %544 = dma.done.wait (%p633_p6), %s168_s7, 1024  }
  0x38   : > { %546 = vsyncadd (%p633_p6), %s168_s7, 4294966272  ;;  %s178_s4 = scalar_lea.sflag [#allocation6], %s711_s23  ;;  %s722_s26 = scalar_lea.vmem [#allocation5], %s369_s25 }
  0x39   : > { %548 = dma.done.wait (%p633_p6), %s178_s4, 1024  }
  0x3a   : > { %550 = vsyncadd (%p633_p6), %s178_s4, 4294966272  ;;  %s383_s27 = sshll.u32 %s611_s13, 6  ;;  %v211_v0 = vld [vmem:[%s715_s14] sm:$0xff]  ;;  %v212_v2 = vld [vmem:[%s715_s14 + $0x8] sm:$0xff]  ;;  %s207_s8 = scalar_lea.vmem [#allocation7], %s369_s25  ;;  %vm238_vm0 = vcmask 949248  }
  0x3b   : > { %v219_v1 = vld [vmem:[%s722_s26] sm:$0xff]  ;;  %v220_v4 = vld [vmem:[%s722_s26 + $0x8] sm:$0xff]  ;;  %v213_v5 = vld [vmem:[%s715_s14 + $0x10] sm:$0xff]  ;;  %s257_s28 = scalar_lea.hbm %s780_s2, %s383_s27  ;;  %s258_s16 = sshll.u32 %s207_s8, 4  ;;  %s259_s16 = int_to_ptr.vmem [resolvable:$true] %s258_s16 }
  0x3c   : > { %v227_v3 = vadd.f32 %v219_v1, %v211_v0  ;;  %v221_v6 = vld [vmem:[%s722_s26 + $0x10] sm:$0xff]  ;;  %v228_v7 = vadd.f32 %v220_v4, %v212_v2  ;;  %v214_v9 = vld [vmem:[%s715_s14 + $0x18] sm:$0xff]  ;;  %v215_v11 = vld [vmem:[%s715_s14 + $0x20] sm:$0xff]  ;;  %s260_s17 = sshll.u32 %s257_s28, 4  ;;  %s245_s19 = scalar_lea.sflag [#allocation4], %s711_s23  ;;  %s261_s17 = int_to_ptr.hbm [resolvable:$true] %s260_s17 }
  0x3d   : > { %v229_v8 = vadd.f32 %v221_v6, %v213_v5  ;;  %v222_v10 = vld [vmem:[%s722_s26 + $0x18] sm:$0xff]  ;;  %v223_v13 = vld [vmem:[%s722_s26 + $0x20] sm:$0xff]  ;;  %v216_v14 = vld [vmem:[%s715_s14 + $0x28] sm:$0xff]  ;;  %s513_s29 = sshra.s32 %s261_s17, 4  ;;  %s519_s24 = scalar_lea.hbm %s780_s2, 256  ;;  %s514_s29 = int_to_ptr.hbm [resolvable:$true] %s513_s29 }
  0x3e   : > { %235 = vst [vmem:[%s207_s8] sm:$0xff] %v227_v3  ;;  %v230_v12 = vadd.f32 %v222_v10, %v214_v9  ;;  %v224_v15 = vld [vmem:[%s722_s26 + $0x28] sm:$0xff]  ;;  %v231_v16 = vadd.f32 %v223_v13, %v215_v11  ;;  %v217_v18 = vld [vmem:[%s715_s14 + $0x30] sm:$0xff]  ;;  %v218_v20 = vld [vmem:[%s715_s14 + $0x38] sm:$0xff]  ;;  %s515_s3 = scalar_lea.hbm %s514_s29, 64  ;;  %p520_p9 = scmp.lt.s32.totalorder %s514_s29, %s780_s2 }
  0x3f   : > { %236 = vst [vmem:[%s207_s8 + $0x8] sm:$0xff] %v228_v7  ;;  %v232_v17 = vadd.f32 %v224_v15, %v216_v14  ;;  %v225_v19 = vld [vmem:[%s722_s26 + $0x30] sm:$0xff]  ;;  %v226_v22 = vld [vmem:[%s722_s26 + $0x38] sm:$0xff]  ;;  %p516_p6 = scmp.ne.s32.totalorder %s514_s29, %s515_s3  ;;  %p521_p1 = scmp.lt.s32.totalorder %s519_s24, %s515_s3 }
  0x40   : > { %237 = vst [vmem:[%s207_s8 + $0x10] sm:$0xff] %v229_v8  ;;  %v233_v21 = vadd.f32 %v225_v19, %v217_v18  ;;  %v234_v23 = vadd.f32 %v226_v22, %v218_v20 }
  0x41   : > { %239 = vst.msk [vmem:[%s207_s8 + $0x18] sm:$0xff] %vm238_vm0, %v230_v12  ;;  %p517_p12 = pnand %p516_p6, %p639_p10  ;;  %p522_p3 = por %p521_p1, %p520_p9 }
  0x42   : > { %240 = vst [vmem:[%s207_s8 + $0x20] sm:$0xff] %v231_v16 }
  0x43   : > { %241 = vst [vmem:[%s207_s8 + $0x28] sm:$0xff] %v232_v17  ;;  %p518_p2 = pneg %p517_p12 }
  0x44   : > { %242 = vst [vmem:[%s207_s8 + $0x30] sm:$0xff] %v233_v21 }
  0x45   : > { %243 = vst.msk [vmem:[%s207_s8 + $0x38] sm:$0xff] %vm238_vm0, %v234_v23  ;;  %p523_p13 = pnand %p522_p3, %p518_p2 }
  0x47   : > { %526 = shalt.err (!%p523_p13)
}
  0x48   : > { %s573_s23 = smov 512   ;;  %s574_s7 = smov 32  }
  0x49   : > { %388 = dma.vmem_to_hbm [thread:$0]  (%p639_p10), %s259_s16, 1024, %s261_s17, %s245_s19, %s573_s23, %s573_s23, %s574_s7  }
  0x4a PF: > { %p402_p0 = scmp.ge.s32.totalorder %s569_s12, 2  ;;  %s275_s14 = sand.u32 1, %s557_s9  }
  0x4b   : > { %s276_s4 = scalar_lea.sflag [#allocation4], %s275_s14 }
  0x4c   : > { %p398_p4 = pnand %p402_p0, %p643_p11 }
  0x4e   : > { %p399_p5 = pneg %p398_p4 }
  0x50   : > { %552 = dma.done.wait (%p399_p5), %s276_s4, 1024  }
  0x51   : > { %554 = vsyncadd (%p399_p5), %s276_s4, 4294966272  ;;  %p18_p7 = scmp.ge.s32.totalorder %s615_s15, 6   ;;  %s787_s9 = smov %s561_s10 }
  0x52   : > { %s788_s10 = smov %s565_s11  ;;  %s789_s11 = smov %s627_s18 }
  0x53   : > { %s790_s12 = smov %s615_s15  ;;  %20 = sbr.rel (!%p18_p7) target bundleno = 7 (0x7), region = 86 }
  0x58   :  { %282 = vsyncpa [#allocation3], 1 }
  0x59   :  { %284 = vsyncpa [#allocation3 + $0x1], 1 }
  0x5a   :  { %285 = vsyncpa [#allocation6], 1 }
  0x5b   :  { %287 = vsyncpa [#allocation6 + $0x1], 1 }
  0x5c   :  { %288 = vsyncpa [#allocation4], 1 }
  0x5d   :  { %290 = vsyncpa [#allocation4 + $0x1], 1 }

</bundles_post_ra>
